<compile_context>
chip_gen: v7x
topology: tpu7x:2x2x1
jax: 0.10.0
libtpu: 0.0.40
codegen_flags: <defaults>
</compile_context>

<pallas_src>
import jax
import jax.numpy as jnp
from jax import lax
from jax.experimental import pallas as pl
from jax.experimental.pallas import tpu as pltpu

PAD = 128  # lane width; all hidden dims are zero-padded to this


def _round_up(x, m):
    return (x + m - 1) // m * m


def _make_kernel(tile_b, f_pad, nu_pad):
    # Static row layout of the packed bf16 weight slab (all offsets are
    # multiples of 16 so bf16 sublane tiles are never straddled).
    r_enc = 0                      # (f_pad, 128)  game-encoder weight
    r_uw1 = r_enc + f_pad          # (nu_pad,128)  fused  user_embedding @ W1_user
    r_w1g = r_uw1 + nu_pad         # (128,   128)  W1_game
    r_w2 = r_w1g + PAD             # (128,   128)  W2

    def kernel(ids_ref, gf_ref, w_ref, b_ref, out_ref):
        f32 = jnp.float32
        bf16 = jnp.bfloat16

        uid = ids_ref[:, 0:1]                       # (TB, 1) int32
        gid = ids_ref[:, 1:2]                       # (TB, 1) int32

        # game_encoder: Linear(F, L) + ReLU, output zero-padded to 128 lanes.
        ge = jnp.dot(gf_ref[...], w_ref[r_enc:r_enc + f_pad, :],
                     preferred_element_type=f32) + b_ref[0:1, :]
        ge = jnp.maximum(ge, 0.0)                   # (TB, 128) f32

        # Fused user-embedding gather + user half of MLP layer 1:
        #   one-hot(uid) @ (user_embedding @ W1_user)   (table is VMEM resident)
        oh_u = jnp.where(
            lax.broadcasted_iota(jnp.int32, (tile_b, nu_pad), 1) == uid,
            1.0, 0.0).astype(bf16)
        h1 = (jnp.dot(ge.astype(bf16), w_ref[r_w1g:r_w1g + PAD, :],
                      preferred_element_type=f32)
              + jnp.dot(oh_u, w_ref[r_uw1:r_uw1 + nu_pad, :],
                        preferred_element_type=f32)
              + b_ref[1:2, :])
        h1 = jnp.maximum(h1, 0.0)                   # (TB, 128) f32

        # MLP layer 2 + ReLU.
        h2 = jnp.maximum(
            jnp.dot(h1.astype(bf16), w_ref[r_w2:r_w2 + PAD, :],
                    preferred_element_type=f32) + b_ref[2:3, :],
            0.0)                                    # (TB, 128) f32, lanes>=H2 are 0

        # Final Linear(H2, 1) + fused game-bias gather, merged into one FMA
        # and a single cross-lane reduction.
        # b_ref[3] = W3 row (zero-padded); b_ref[4] = game_bias + b3 + global.
        oh_g = jnp.where(
            lax.broadcasted_iota(jnp.int32, (tile_b, PAD), 1) == gid,
            1.0, 0.0)                               # (TB, 128) f32
        contrib = h2 * b_ref[3:4, :] + oh_g * b_ref[4:5, :]
        out_ref[...] = jnp.sum(contrib, axis=-1, keepdims=True)   # (TB, 1)

    return kernel


def pack_params(params, num_users, num_games, feat_dim, latent_dim,
                user_emb_dim, mlp_hidden_dim):
    """Pack all weights into one bf16 slab and all biases into one f32 slab."""
    L, U, H = latent_dim, user_emb_dim, mlp_hidden_dim
    H2 = H // 2
    assert max(L, U, H, H2) <= PAD
    assert num_games <= PAD  # TODO(synk): DMA-gather path for larger game tables
    f_pad = _round_up(feat_dim, 16)
    nu_pad = _round_up(num_users, 16)

    def pad2(m, rows, cols):
        out = jnp.zeros((rows, cols), jnp.float32)
        return out.at[:m.shape[0], :m.shape[1]].set(m.astype(jnp.float32))

    # Fold the user-embedding table through the user half of W1 (valid because
    # there is no nonlinearity between the embedding lookup and layer 1).
    uw1 = params["user_embedding"].astype(jnp.float32) @ params["w1_user"].astype(jnp.float32)

    w_enc = pad2(params["w_enc"], f_pad, PAD)
    uw1_p = pad2(uw1, nu_pad, PAD)
    w1g = pad2(params["w1_game"], PAD, PAD)
    w2 = pad2(params["w2"], PAD, PAD)
    wslab = jnp.concatenate([w_enc, uw1_p, w1g, w2], axis=0).astype(jnp.bfloat16)

    b_enc = pad2(params["b_enc"], 1, PAD)
    b1 = pad2(params["b1"], 1, PAD)
    b2 = pad2(params["b2"], 1, PAD)
    w3row = pad2(params["w3"].T, 1, PAD)
    gbias = (params["game_bias"][:, 0] + params["b3"][0, 0]
             + params["global_bias"][0])
    gbias = pad2(gbias[None, :], 1, PAD)
    bslab = jnp.concatenate(
        [b_enc, b1, b2, w3row, gbias, jnp.zeros((3, PAD), jnp.float32)], axis=0)

    dims = dict(f_pad=f_pad, nu_pad=nu_pad, r_tot=wslab.shape[0])
    return wslab, bslab, dims


def rating_predictor_forward(game_features, user_ids, game_ids,
                             wslab, bslab, dims, *, tile_b=128):
    """Returns rating_pred of shape [B]."""
    B, F = game_features.shape
    f_pad, nu_pad, r_tot = dims["f_pad"], dims["nu_pad"], dims["r_tot"]
    b_pad = _round_up(B, tile_b)

    gf = jnp.zeros((b_pad, f_pad), jnp.bfloat16)
    gf = gf.at[:B, :F].set(game_features.astype(jnp.bfloat16))
    ids = jnp.zeros((b_pad, 2), jnp.int32)
    ids = ids.at[:B, 0].set(user_ids.astype(jnp.int32))
    ids = ids.at[:B, 1].set(game_ids.astype(jnp.int32))

    kernel = _make_kernel(tile_b, f_pad, nu_pad)
    out = pl.pallas_call(
        kernel,
        out_shape=jax.ShapeDtypeStruct((b_pad, 1), jnp.float32),
        grid=(b_pad // tile_b,),
        in_specs=[
            pl.BlockSpec((tile_b, 2), lambda i: (i, 0)),       # ids
            pl.BlockSpec((tile_b, f_pad), lambda i: (i, 0)),   # game features
            pl.BlockSpec((r_tot, PAD), lambda i: (0, 0)),      # weight slab (resident)
            pl.BlockSpec((8, PAD), lambda i: (0, 0)),          # bias slab (resident)
        ],
        out_specs=pl.BlockSpec((tile_b, 1), lambda i: (i, 0)),
        compiler_params=pltpu.CompilerParams(
            dimension_semantics=("parallel",)),
    )(ids, gf, wslab, bslab)
    return out[:B, 0]


def make_params(key, num_users, num_games, feat_dim, latent_dim,
                user_emb_dim, mlp_hidden_dim):
    ks = jax.random.split(key, 10)
    L, U, H = latent_dim, user_emb_dim, mlp_hidden_dim
    H2 = H // 2

    def init(k, shape, scale):
        return (scale * jax.random.normal(k, shape)).astype(jnp.float32)

    return {
        # synthetic game_encoder: Linear(feat_dim, latent_dim) (+ReLU in-kernel)
        "w_enc": init(ks[0], (feat_dim, L), 1.0 / jnp.sqrt(feat_dim)),
        "b_enc": init(ks[1], (1, L), 0.02),
        # embeddings
        "user_embedding": init(ks[2], (num_users, U), 0.1),
        "game_bias": init(ks[3], (num_games, 1), 0.1),
        "global_bias": jnp.zeros((1,), jnp.float32),
        # MLP: Linear(L+U, H) split into game/user halves, Linear(H, H//2), Linear(H//2, 1)
        "w1_game": init(ks[4], (L, H), 1.0 / jnp.sqrt(L + U)),
        "w1_user": init(ks[5], (U, H), 1.0 / jnp.sqrt(L + U)),
        "b1": init(ks[6], (1, H), 0.02),
        "w2": init(ks[7], (H, H2), 1.0 / jnp.sqrt(H)),
        "b2": init(ks[8], (1, H2), 0.02),
        "w3": init(ks[9], (H2, 1), 1.0 / jnp.sqrt(H2)),
        "b3": jnp.zeros((1, 1), jnp.float32),
    }


def reference_forward(game_features, user_ids, game_ids, params):
    """Pure-JAX f32 reference matching the PyTorch semantics."""
    game_emb = jnp.maximum(game_features @ params["w_enc"] + params["b_enc"], 0.0)
    user_emb = params["user_embedding"][user_ids]
    game_bias = params["game_bias"][game_ids][:, 0]
    w1 = jnp.concatenate([params["w1_game"], params["w1_user"]], axis=0)
    x = jnp.concatenate([game_emb, user_emb], axis=1)
    h1 = jnp.maximum(x @ w1 + params["b1"], 0.0)
    h2 = jnp.maximum(h1 @ params["w2"] + params["b2"], 0.0)
    pred = (h2 @ params["w3"] + params["b3"])[:, 0]
    return pred + game_bias + params["global_bias"][0]


if __name__ == "__main__":
    B = 8
    FEAT_DIM = 48
    LATENT_DIM = 64
    USER_EMB_DIM = 32
    MLP_HIDDEN = 128
    NUM_USERS = 10
    NUM_GAMES = 12

    key = jax.random.PRNGKey(0)
    k_param, k_feat, k_uid, k_gid = jax.random.split(key, 4)

    params = make_params(k_param, NUM_USERS, NUM_GAMES, FEAT_DIM,
                         LATENT_DIM, USER_EMB_DIM, MLP_HIDDEN)
    wslab, bslab, dims = pack_params(params, NUM_USERS, NUM_GAMES, FEAT_DIM,
                                     LATENT_DIM, USER_EMB_DIM, MLP_HIDDEN)

    game_features = jax.random.normal(k_feat, (B, FEAT_DIM), jnp.float32)
    user_ids = jax.random.randint(k_uid, (B,), 0, NUM_USERS)
    game_ids = jax.random.randint(k_gid, (B,), 0, NUM_GAMES)

    out = rating_predictor_forward(game_features, user_ids, game_ids,
                                   wslab, bslab, dims)
    out = jax.block_until_ready(out)

    ref = reference_forward(game_features, user_ids, game_ids, params)
    assert out.shape == (B,)
    # bf16 MXU matmuls vs. pure-f32 reference -> loosened tolerance.
    assert jnp.allclose(out, ref, atol=5e-2, rtol=5e-2), (out, ref)

    print("KERNEL_OK")
</pallas_src>

<mosaic_0001>
module attributes {stable_mosaic.version = 11 : i64} {
  func.func @kernel(%arg0: i32, %arg1: memref<128x2xi32, #tpu.memory_space<vmem>>, %arg2: memref<128x48xbf16, #tpu.memory_space<vmem>>, %arg3: memref<320x128xbf16, #tpu.memory_space<vmem>>, %arg4: memref<8x128xf32, #tpu.memory_space<vmem>>, %arg5: memref<128x1xf32, #tpu.memory_space<vmem>>) attributes {dimension_semantics = [#tpu.dimension_semantics<parallel>], iteration_bounds = array<i64: 1>, scalar_prefetch = 0 : i64, scratch_operands = 0 : i64, tpu.core_type = #tpu.core_type<tc>, window_params = [{transform_indices = @transform_0, window_bounds = array<i64: 128, 2>}, {transform_indices = @transform_1, window_bounds = array<i64: 128, 48>}, {pipeline_mode = #tpu.pipeline_mode<synchronous>, transform_indices = @transform_2, window_bounds = array<i64: 320, 128>}, {pipeline_mode = #tpu.pipeline_mode<synchronous>, transform_indices = @transform_3, window_bounds = array<i64: 8, 128>}, {transform_indices = @transform_4, window_bounds = array<i64: 128, 1>}]} {
    %c0 = arith.constant 0 : index
    %c0_0 = arith.constant 0 : index
    %0 = vector.load %arg1[%c0, %c0_0] : memref<128x2xi32, #tpu.memory_space<vmem>>, vector<128x1xi32>
    %c0_1 = arith.constant 0 : index
    %c1 = arith.constant 1 : index
    %1 = vector.load %arg1[%c0_1, %c1] : memref<128x2xi32, #tpu.memory_space<vmem>>, vector<128x1xi32>
    %c0_2 = arith.constant 0 : index
    %c0_3 = arith.constant 0 : index
    %2 = vector.load %arg2[%c0_2, %c0_3] : memref<128x48xbf16, #tpu.memory_space<vmem>>, vector<128x48xbf16>
    %c0_4 = arith.constant 0 : index
    %c0_5 = arith.constant 0 : index
    %3 = vector.load %arg3[%c0_4, %c0_5] : memref<320x128xbf16, #tpu.memory_space<vmem>>, vector<48x128xbf16>
    %cst = arith.constant dense<0.000000e+00> : vector<128x128xf32>
    %4 = tpu.matmul %2, %3, %cst {dimension_numbers = #tpu.dot_dimension_numbers<[1], [0], [0], [1], [0, 0, 1, 1], [], []>} : vector<128x48xbf16>, vector<48x128xbf16>, vector<128x128xf32> -> vector<128x128xf32>
    %c0_6 = arith.constant 0 : index
    %c0_7 = arith.constant 0 : index
    %5 = vector.load %arg4[%c0_6, %c0_7] : memref<8x128xf32, #tpu.memory_space<vmem>>, vector<1x128xf32>
    %6 = vector.broadcast %5 : vector<1x128xf32> to vector<128x128xf32>
    %7 = arith.addf %4, %6 : vector<128x128xf32>
    %cst_8 = arith.constant 0.000000e+00 : f32
    %8 = vector.broadcast %cst_8 : f32 to vector<128x128xf32>
    %9 = arith.maximumf %7, %8 : vector<128x128xf32>
    %10 = tpu.iota {dimensions = array<i32: 1>} : vector<128x16xi32>
    %11 = vector.broadcast %0 : vector<128x1xi32> to vector<128x16xi32>
    %12 = arith.cmpi eq, %10, %11 : vector<128x16xi32>
    %cst_9 = arith.constant 1.000000e+00 : f32
    %cst_10 = arith.constant 0.000000e+00 : f32
    %13 = vector.broadcast %cst_9 : f32 to vector<128x16xf32>
    %14 = vector.broadcast %cst_10 : f32 to vector<128x16xf32>
    %15 = arith.select %12, %13, %14 : vector<128x16xi1>, vector<128x16xf32>
    %16 = arith.truncf %15 : vector<128x16xf32> to vector<128x16xbf16>
    %17 = arith.truncf %9 : vector<128x128xf32> to vector<128x128xbf16>
    %c64 = arith.constant 64 : index
    %c0_11 = arith.constant 0 : index
    %18 = vector.load %arg3[%c64, %c0_11] : memref<320x128xbf16, #tpu.memory_space<vmem>>, vector<128x128xbf16>
    %cst_12 = arith.constant dense<0.000000e+00> : vector<128x128xf32>
    %19 = tpu.matmul %17, %18, %cst_12 {dimension_numbers = #tpu.dot_dimension_numbers<[1], [0], [0], [1], [0, 0, 1, 1], [], []>} : vector<128x128xbf16>, vector<128x128xbf16>, vector<128x128xf32> -> vector<128x128xf32>
    %c48 = arith.constant 48 : index
    %c0_13 = arith.constant 0 : index
    %20 = vector.load %arg3[%c48, %c0_13] : memref<320x128xbf16, #tpu.memory_space<vmem>>, vector<16x128xbf16>
    %cst_14 = arith.constant dense<0.000000e+00> : vector<128x128xf32>
    %21 = tpu.matmul %16, %20, %cst_14 {dimension_numbers = #tpu.dot_dimension_numbers<[1], [0], [0], [1], [0, 0, 1, 1], [], []>} : vector<128x16xbf16>, vector<16x128xbf16>, vector<128x128xf32> -> vector<128x128xf32>
    %22 = arith.addf %19, %21 : vector<128x128xf32>
    %c1_15 = arith.constant 1 : index
    %c0_16 = arith.constant 0 : index
    %23 = vector.load %arg4[%c1_15, %c0_16] : memref<8x128xf32, #tpu.memory_space<vmem>>, vector<1x128xf32>
    %24 = vector.broadcast %23 : vector<1x128xf32> to vector<128x128xf32>
    %25 = arith.addf %22, %24 : vector<128x128xf32>
    %cst_17 = arith.constant 0.000000e+00 : f32
    %26 = vector.broadcast %cst_17 : f32 to vector<128x128xf32>
    %27 = arith.maximumf %25, %26 : vector<128x128xf32>
    %28 = arith.truncf %27 : vector<128x128xf32> to vector<128x128xbf16>
    %c192 = arith.constant 192 : index
    %c0_18 = arith.constant 0 : index
    %29 = vector.load %arg3[%c192, %c0_18] : memref<320x128xbf16, #tpu.memory_space<vmem>>, vector<128x128xbf16>
    %cst_19 = arith.constant dense<0.000000e+00> : vector<128x128xf32>
    %30 = tpu.matmul %28, %29, %cst_19 {dimension_numbers = #tpu.dot_dimension_numbers<[1], [0], [0], [1], [0, 0, 1, 1], [], []>} : vector<128x128xbf16>, vector<128x128xbf16>, vector<128x128xf32> -> vector<128x128xf32>
    %c2 = arith.constant 2 : index
    %c0_20 = arith.constant 0 : index
    %31 = vector.load %arg4[%c2, %c0_20] : memref<8x128xf32, #tpu.memory_space<vmem>>, vector<1x128xf32>
    %32 = vector.broadcast %31 : vector<1x128xf32> to vector<128x128xf32>
    %33 = arith.addf %30, %32 : vector<128x128xf32>
    %cst_21 = arith.constant 0.000000e+00 : f32
    %34 = vector.broadcast %cst_21 : f32 to vector<128x128xf32>
    %35 = arith.maximumf %33, %34 : vector<128x128xf32>
    %36 = tpu.iota {dimensions = array<i32: 1>} : vector<128x128xi32>
    %37 = vector.broadcast %1 : vector<128x1xi32> to vector<128x128xi32>
    %38 = arith.cmpi eq, %36, %37 : vector<128x128xi32>
    %cst_22 = arith.constant 1.000000e+00 : f32
    %cst_23 = arith.constant 0.000000e+00 : f32
    %39 = vector.broadcast %cst_22 : f32 to vector<128x128xf32>
    %40 = vector.broadcast %cst_23 : f32 to vector<128x128xf32>
    %41 = arith.select %38, %39, %40 : vector<128x128xi1>, vector<128x128xf32>
    %c3 = arith.constant 3 : index
    %c0_24 = arith.constant 0 : index
    %42 = vector.load %arg4[%c3, %c0_24] : memref<8x128xf32, #tpu.memory_space<vmem>>, vector<1x128xf32>
    %43 = vector.broadcast %42 : vector<1x128xf32> to vector<128x128xf32>
    %44 = arith.mulf %35, %43 : vector<128x128xf32>
    %c4 = arith.constant 4 : index
    %c0_25 = arith.constant 0 : index
    %45 = vector.load %arg4[%c4, %c0_25] : memref<8x128xf32, #tpu.memory_space<vmem>>, vector<1x128xf32>
    %46 = vector.broadcast %45 : vector<1x128xf32> to vector<128x128xf32>
    %47 = arith.mulf %41, %46 : vector<128x128xf32>
    %48 = arith.addf %44, %47 : vector<128x128xf32>
    %cst_26 = arith.constant dense<0.000000e+00> : vector<128xf32>
    %49 = vector.multi_reduction <add>, %48, %cst_26 [1] : vector<128x128xf32> to vector<128xf32>
    %50 = vector.shape_cast %49 : vector<128xf32> to vector<128x1xf32>
    %c0_27 = arith.constant 0 : index
    %c0_28 = arith.constant 0 : index
    %51 = vector.load %arg5[%c0_27, %c0_28] : memref<128x1xf32, #tpu.memory_space<vmem>>, vector<128x1xf32>
    tpu.vector_store %arg5[%c0_27, %c0_28], %50 {strides = array<i32>} : memref<128x1xf32, #tpu.memory_space<vmem>>, vector<128x1xf32>,
    return
  }
  func.func @transform_0(%arg0: i32) -> (i32, i32) {
    %c0_i32 = arith.constant 0 : i32
    %c0_i32_0 = arith.constant 0 : i32
    return %arg0, %c0_i32 : i32, i32
  }
  func.func @transform_1(%arg0: i32) -> (i32, i32) {
    %c0_i32 = arith.constant 0 : i32
    %c0_i32_0 = arith.constant 0 : i32
    return %arg0, %c0_i32 : i32, i32
  }
  func.func @transform_2(%arg0: i32) -> (i32, i32) {
    %c0_i32 = arith.constant 0 : i32
    %c0_i32_0 = arith.constant 0 : i32
    %c0_i32_1 = arith.constant 0 : i32
    return %c0_i32, %c0_i32_0 : i32, i32
  }
  func.func @transform_3(%arg0: i32) -> (i32, i32) {
    %c0_i32 = arith.constant 0 : i32
    %c0_i32_0 = arith.constant 0 : i32
    %c0_i32_1 = arith.constant 0 : i32
    return %c0_i32, %c0_i32_0 : i32, i32
  }
  func.func @transform_4(%arg0: i32) -> (i32, i32) {
    %c0_i32 = arith.constant 0 : i32
    %c0_i32_0 = arith.constant 0 : i32
    return %arg0, %c0_i32 : i32, i32
  }
}

</mosaic_0001>

<bundles_post_ra>
// kernel: tpu_custom_call.1
= control target key start
LH: loop header
LB: loop body
LE: loop exit
PB: predicated region body
PF: predicated region fallthrough
CT: control target
= control target key end

     0   :  { %v1320_v1 = vmov 0   ;;  %vm119_vm0 = vcmask 392192   ;;  %v257_v30 = vlaneseq  ;;  %v1321_v38 = vmov 0.0   ;;  %s1782_s2 = inlined_call_operand.vmem [shape: bf16[320,128], index: 2, kind: input, shape index: {}]   ;;  %s1783_s1 = inlined_call_operand.vmem [shape: bf16[128,48], index: 1, kind: input, shape index: {}]   ;;  %s1784_s0 = inlined_call_operand.vmem [shape: s32[128,2], index: 0, kind: input, shape index: {}]   ;;  %s1785_s3 = inlined_call_operand.vmem [shape: f32[8,128], index: 3, kind: input, shape index: {}]   ;;  %s1786_s4 = inlined_call_operand.vmem [shape: f32[128,1], index: 4, kind: output, shape index: {}]  }
   0x1   :  { %v1292_v0 = vld [vmem:[%s1782_s2] sm:$0xff]   ;;  %1288 = vset.pattern.permute.xlu0 %v1320_v1  ;;  %1289 = vset.pattern.permute.xlu1 %v1320_v1  ;;  %v1293_v2 = vld [vmem:[%s1782_s2 + $0x8] sm:$0xff]   ;;  %v1294_v4 = vld [vmem:[%s1782_s2 + $0x10] sm:$0xff]   ;;  %vm379_vm5 = vcmask 130048  }
   0x2   :  { %1165 = vmatprep.subr.bf16.mxu0 %v1292_v0  ;;  %v1295_v3 = vld [vmem:[%s1783_s1] sm:$0xff]   ;;  %v1296_v5 = vld [vmem:[%s1783_s1 + $0x8] sm:$0xff]   ;;  %v1297_v6 = vld [vmem:[%s1783_s1 + $0x10] sm:$0xff]   ;;  %v1497_v33 = vand.u32 127, %v257_v30 }
   0x3   :  { %1166 = vmatpush3.bf16.msra.mxu0 %v1292_v0  ;;  %1171 = vmatprep.mubr.msk.bf16.mxu0 %vm119_vm0, %v1295_v3  ;;  %v1370_v7 = vld [vmem:[%s1784_s0] sm:$0xff]  ;;  %v1375_v8 = vld [vmem:[%s1784_s0 + $0x10] sm:$0xff]  ;;  %v1382_v9 = vld [vmem:[%s1784_s0 + $0x8] sm:$0xff] }
   0x4   :  { %1167 = vmatprep.subr.bf16.mxu0 %v1293_v2  ;;  %260 = vperm.xlu0 %1288, %v1370_v7   ;;  %v1387_v10 = vld [vmem:[%s1784_s0 + $0x18] sm:$0xff]  ;;  %v1394_v11 = vld [vmem:[%s1784_s0 + $0x28] sm:$0xff]  ;;  %v1404_v13 = vld [vmem:[%s1784_s0 + $0x20] sm:$0xff] }
   0x5   :  { %266 = vperm.xlu1 %1289, %v1375_v8   ;;  %v1298_v12 = vld [vmem:[%s1783_s1 + $0x18] sm:$0xff]   ;;  %v1299_v14 = vld [vmem:[%s1783_s1 + $0x20] sm:$0xff]   ;;  %v1422_v17 = vld [vmem:[%s1784_s0 + $0x30] sm:$0xff] }
   0x6   :  { %v1303_v15 = vld [vmem:[%s1782_s2 + $0x18] sm:$0xff]   ;;  %v1429_v18 = vld [vmem:[%s1784_s0 + $0x48] sm:$0xff]  ;;  %v1434_v19 = vld [vmem:[%s1784_s0 + $0x40] sm:$0xff] }
   0x7   :  { %1168 = vmatpush3.bf16.msra.mxu0 %v1293_v2  ;;  %v1415_v16 = vld [vmem:[%s1784_s0 + $0x38] sm:$0xff]  ;;  %1187 = vmatprep.subr.bf16.mxu1 %v1303_v15  ;;  %v1300_v20 = vld [vmem:[%s1783_s1 + $0x28] sm:$0xff]   ;;  %v1301_v21 = vld [vmem:[%s1783_s1 + $0x30] sm:$0xff]  }
   0x8   :  { %1169 = vmatprep.subr.bf16.mxu0 %v1294_v4  ;;  %263 = vperm.xlu0 %1288, %v1382_v9   ;;  %v1449_v22 = vld [vmem:[%s1784_s0 + $0x58] sm:$0xff]  ;;  %v1454_v23 = vld [vmem:[%s1784_s0 + $0x50] sm:$0xff]  ;;  %v1463_v24 = vld [vmem:[%s1784_s0 + $0x68] sm:$0xff] }
   0x9   :  { %269 = vperm.xlu1 %1289, %v1387_v10   ;;  %1188 = vmatpush3.bf16.msra.mxu1 %v1303_v15  ;;  %v1468_v25 = vld [vmem:[%s1784_s0 + $0x60] sm:$0xff]  ;;  %v1302_v26 = vld [vmem:[%s1783_s1 + $0x38] sm:$0xff]   ;;  %v1483_v28 = vld [vmem:[%s1784_s0 + $0x70] sm:$0xff] }
   0xa   :  { %v1478_v27 = vld [vmem:[%s1784_s0 + $0x78] sm:$0xff]  ;;  %v1304_v29 = vld [vmem:[%s1782_s2 + $0x20] sm:$0xff]   ;;  %v1313_v32 = vld [vmem:[%s1782_s2 + $0x68] sm:$0xff]  }
   0xb   :  { %1170 = vmatpush3.bf16.msra.mxu0 %v1294_v4  ;;  %1205 = vmatprep.subr.bf16.mxu1 %v1304_v29  ;;  %v1312_v31 = vld [vmem:[%s1782_s2 + $0x60] sm:$0xff]   ;;  %v1314_v34 = vld [vmem:[%s1782_s2 + $0x70] sm:$0xff]   ;;  %v1315_v37 = vld [vmem:[%s1782_s2 + $0x78] sm:$0xff]  }
   0xc   :  { %272 = vperm.xlu0 %1288, %v1404_v13   ;;  %1237 = vmatprep.subr.bf16.mxu0 %v1312_v31  ;;  %v1316_v43 = vld [vmem:[%s1782_s2 + $0x80] sm:$0xff]   ;;  %v1305_v50 = vld [vmem:[%s1782_s2 + $0x28] sm:$0xff]   ;;  %v1306_v57 = vld [vmem:[%s1782_s2 + $0x30] sm:$0xff]  }
   0xd   :  { %275 = vperm.xlu1 %1289, %v1394_v11   ;;  %v1317_v51 = vld [vmem:[%s1782_s2 + $0x88] sm:$0xff]   ;;  %v1307_v63 = vld [vmem:[%s1782_s2 + $0x38] sm:$0xff]  }
   0xe   :  { %1172 = vmatmul.mubr.msk.bf16.vlgmr.msra.gmra.mrb[0].mxu0 %vm119_vm0, %v1296_v5  ;;  %v1308_v5 = vld [vmem:[%s1782_s2 + $0x40] sm:$0xff]  }
   0xf   :  { %1175 = vmatprep.mubr.msk.bf16.mxu0 %vm119_vm0, %v1297_v6  ;;  %1238 = vmatpush3.bf16.msra.mxu0 %v1312_v31 }
  0x10   :  { %278 = vperm.xlu0 %1288, %v1422_v17   ;;  %1239 = vmatprep.subr.bf16.mxu0 %v1313_v32 }
  0x11   :  { %281 = vperm.xlu1 %1289, %v1415_v16  }
  0x13   :  { %1240 = vmatpush3.bf16.msra.mxu0 %v1313_v32 }
  0x14   :  { %284 = vperm.xlu0 %1288, %v1434_v19   ;;  %1241 = vmatprep.subr.bf16.mxu0 %v1314_v34 }
  0x15   :  { %287 = vperm.xlu1 %1289, %v1429_v18  }
  0x16   :  { %1176 = vmatmul.mubr.msk.bf16.gmra.mrb[4].mxu0 %vm119_vm0, %v1298_v12 }
  0x17   :  { %1179 = vmatprep.mubr.msk.bf16.mxu0 %vm119_vm0, %v1299_v14  ;;  %1242 = vmatpush3.bf16.msra.mxu0 %v1314_v34  ;;  %v1310_v34 = vld [vmem:[%s1782_s2 + $0x50] sm:$0xff]  }
  0x18   :  { %290 = vperm.xlu0 %1288, %v1454_v23   ;;  %1243 = vmatprep.subr.bf16.mxu0 %v1315_v37 }
  0x19   :  { %293 = vperm.xlu1 %1289, %v1449_v22  }
  0x1b   :  { %1244 = vmatpush3.bf16.msra.mxu0 %v1315_v37 }
  0x1c   :  { %296 = vperm.xlu0 %1288, %v1468_v25   ;;  %1245 = vmatprep.subr.bf16.mxu0 %v1316_v43 }
  0x1d   :  { %299 = vperm.xlu1 %1289, %v1463_v24  }
  0x1e   :  { %1180 = vmatmul.mubr.msk.bf16.gmra.mrb[8].mxu0 %vm119_vm0, %v1300_v20 }
  0x1f   :  { %1183 = vmatprep.mubr.msk.bf16.mxu0 %vm119_vm0, %v1301_v21  ;;  %1246 = vmatpush3.bf16.msra.mxu0 %v1316_v43  ;;  %v1309_v21 = vld [vmem:[%s1782_s2 + $0x48] sm:$0xff]  }
  0x20   :  { %302 = vperm.xlu0 %1288, %v1483_v28   ;;  %1247 = vmatprep.subr.bf16.mxu0 %v1317_v51 }
  0x21   :  { %305 = vperm.xlu1 %1289, %v1478_v27  }
  0x23   :  { %1248 = vmatpush3.bf16.msra.mxu0 %v1317_v51 }
  0x26   :  { %1184 = vmatmul.mubr.msk.bf16.gmra.mrb[12].mxu0 %vm119_vm0, %v1302_v26 }
  0x83   :  { %v261_v35 = vpop.permute.xlu0 %260 }
  0x84   :  { %v267_v36 = vpop.permute.xlu1 %266  ;;  %vm307_vm1 = vcmp.eq.s32.totalorder %v1497_v33, %v261_v35 }
  0x85   :  { %vm309_vm2 = vcmp.eq.s32.totalorder %v1497_v33, %v267_v36  ;;  %v323_v39 = vsel %vm307_vm1, 1.0, %v1321_v38 }
  0x86   :  { %v325_v40 = vsel %vm309_vm2, 1.0, %v1321_v38 }
  0x87   :  { %v264_v41 = vpop.permute.xlu0 %263 }
  0x88   :  { %v270_v42 = vpop.permute.xlu1 %269  ;;  %vm308_vm3 = vcmp.eq.s32.totalorder %v1497_v33, %v264_v41 }
  0x89   :  { %vm310_vm4 = vcmp.eq.s32.totalorder %v1497_v33, %v270_v42  ;;  %v324_v44 = vsel %vm308_vm3, 1.0, %v1321_v38 }
  0x8a   :  { %v326_v45 = vsel %vm310_vm4, 1.0, %v1321_v38  ;;  %v339_v47 = vpack.c.bf16 %v324_v44, %v323_v39  ;;  %v1311_v39 = vld [vmem:[%s1782_s2 + $0x58] sm:$0xff]  }
  0x8b   :  { %v340_v46 = vpack.c.bf16 %v326_v45, %v325_v40  ;;  %v273_v49 = vpop.permute.xlu0 %272  ;;  %v1064_v40 = vld [vmem:[%s1785_s3] ss:$0 sm:$0xff] }
  0x8c   :  { %v276_v48 = vpop.permute.xlu1 %275  ;;  %1189 = vmatprep.mubr.msk.bf16.mxu1 %vm379_vm5, %v339_v47  ;;  %vm311_vm7 = vcmp.eq.s32.totalorder %v1497_v33, %v273_v49 }
  0x8d   :  { %vm312_vm6 = vcmp.eq.s32.totalorder %v1497_v33, %v276_v48  ;;  %v327_v53 = vsel %vm311_vm7, 1.0, %v1321_v38  ;;  %1190 = vmatmul.mubr.msk.bf16.vlgmr.msra.gmra.mrb[0].mxu1 %vm379_vm5, %v340_v46 }
  0x8e   :  { %v328_v52 = vsel %vm312_vm6, 1.0, %v1321_v38  ;;  %1206 = vmatpush3.bf16.msra.mxu1 %v1304_v29 }
  0x8f   :  { %v341_v54 = vpack.c.bf16 %v328_v52, %v327_v53  ;;  %v279_v56 = vpop.permute.xlu0 %278  ;;  %1207 = vmatprep.subr.bf16.mxu1 %v1305_v50 }
  0x90   :  { %v282_v55 = vpop.permute.xlu1 %281  ;;  %vm313_vm9 = vcmp.eq.s32.totalorder %v1497_v33, %v279_v56 }
  0x91   :  { %vm314_vm8 = vcmp.eq.s32.totalorder %v1497_v33, %v282_v55  ;;  %1193 = vmatprep.mubr.msk.bf16.mxu1 %vm379_vm5, %v341_v54  ;;  %v329_v59 = vsel %vm313_vm9, 1.0, %v1321_v38 }
  0x92   :  { %v330_v58 = vsel %vm314_vm8, 1.0, %v1321_v38  ;;  %1208 = vmatpush3.bf16.msra.mxu1 %v1305_v50 }
  0x93   :  { %v342_v60 = vpack.c.bf16 %v330_v58, %v329_v59  ;;  %v285_v62 = vpop.permute.xlu0 %284  ;;  %1209 = vmatprep.subr.bf16.mxu1 %v1306_v57 }
  0x94   :  { %v288_v61 = vpop.permute.xlu1 %287  ;;  %vm315_vm11 = vcmp.eq.s32.totalorder %v1497_v33, %v285_v62 }
  0x95   :  { %vm316_vm10 = vcmp.eq.s32.totalorder %v1497_v33, %v288_v61  ;;  %v331_v1 = vsel %vm315_vm11, 1.0, %v1321_v38  ;;  %1194 = vmatmul.mubr.msk.bf16.gmra.mrb[4].mxu1 %vm379_vm5, %v342_v60 }
  0x96   :  { %v332_v0 = vsel %vm316_vm10, 1.0, %v1321_v38  ;;  %1210 = vmatpush3.bf16.msra.mxu1 %v1306_v57 }
  0x97   :  { %v343_v2 = vpack.c.bf16 %v332_v0, %v331_v1  ;;  %v291_v4 = vpop.permute.xlu0 %290  ;;  %1211 = vmatprep.subr.bf16.mxu1 %v1307_v63 }
  0x98   :  { %v294_v3 = vpop.permute.xlu1 %293  ;;  %vm317_vm13 = vcmp.eq.s32.totalorder %v1497_v33, %v291_v4 }
  0x99   :  { %vm318_vm12 = vcmp.eq.s32.totalorder %v1497_v33, %v294_v3  ;;  %1197 = vmatprep.mubr.msk.bf16.mxu1 %vm379_vm5, %v343_v2  ;;  %v333_v12 = vsel %vm317_vm13, 1.0, %v1321_v38 }
  0x9a   :  { %v334_v6 = vsel %vm318_vm12, 1.0, %v1321_v38  ;;  %1212 = vmatpush3.bf16.msra.mxu1 %v1307_v63 }
  0x9b   :  { %v344_v14 = vpack.c.bf16 %v334_v6, %v333_v12  ;;  %v297_v20 = vpop.permute.xlu0 %296  ;;  %1213 = vmatprep.subr.bf16.mxu1 %v1308_v5 }
  0x9c   :  { %v300_v15 = vpop.permute.xlu1 %299  ;;  %vm319_vm15 = vcmp.eq.s32.totalorder %v1497_v33, %v297_v20 }
  0x9d   :  { %vm320_vm14 = vcmp.eq.s32.totalorder %v1497_v33, %v300_v15  ;;  %v335_v29 = vsel %vm319_vm15, 1.0, %v1321_v38  ;;  %1198 = vmatmul.mubr.msk.bf16.gmra.mrb[8].mxu1 %vm379_vm5, %v344_v14 }
  0x9e   :  { %v336_v26 = vsel %vm320_vm14, 1.0, %v1321_v38  ;;  %1214 = vmatpush3.bf16.msra.mxu1 %v1308_v5 }
  0x9f   :  { %v345_v30 = vpack.c.bf16 %v336_v26, %v335_v29  ;;  %v303_v32 = vpop.permute.xlu0 %302  ;;  %1215 = vmatprep.subr.bf16.mxu1 %v1309_v21 }
  0xa0   :  { %v306_v31 = vpop.permute.xlu1 %305  ;;  %vm321_vm1 = vcmp.eq.s32.totalorder %v1497_v33, %v303_v32 }
  0xa1   :  { %vm322_vm0 = vcmp.eq.s32.totalorder %v1497_v33, %v306_v31  ;;  %1201 = vmatprep.mubr.msk.bf16.mxu1 %vm379_vm5, %v345_v30  ;;  %v337_v36 = vsel %vm321_vm1, 1.0, %v1321_v38 }
  0xa2   :  { %v338_v35 = vsel %vm322_vm0, 1.0, %v1321_v38  ;;  %1216 = vmatpush3.bf16.msra.mxu1 %v1309_v21 }
  0xa3   :  { %v346_v37 = vpack.c.bf16 %v338_v35, %v337_v36  ;;  %1217 = vmatprep.subr.bf16.mxu1 %v1310_v34 }
  0xa5   :  { %1202 = vmatmul.mubr.msk.bf16.gmra.mrb[12].mxu1 %vm379_vm5, %v346_v37 }
  0xa6   :  { %1218 = vmatpush3.bf16.msra.mxu1 %v1310_v34 }
  0xa7   :  { %1219 = vmatprep.subr.bf16.mxu1 %v1311_v39 }
  0xaa   :  { %1220 = vmatpush3.bf16.msra.mxu1 %v1311_v39 }
  0xe1   :  { %v1173_v41 = vpop.f32.mrb[0].mxu0 }
  0xe2   :  { %v187_v42 = vadd.f32 %v1173_v41, %v1064_v40  ;;  %v178_v43 = vpop.f32.mrb[1].mxu0 }
  0xe3   :  { %v179_v44 = vadd.f32 %v1064_v40, %v178_v43  ;;  %v1174_v45 = vpop.f32.mrb[2].mxu0 }
  0xe4   :  { %v190_v46 = vadd.f32 %v1174_v45, %v1064_v40  ;;  %v181_v47 = vpop.f32.mrb[3].mxu0  ;;  %v243_v49 = vmax.f32 %v187_v42, 0.0 }
  0xe5   :  { %v182_v48 = vadd.f32 %v1064_v40, %v181_v47  ;;  %v241_v51 = vmax.f32 %v179_v44, 0.0 }
  0xe6   :  { %v244_v50 = vmax.f32 %v190_v46, 0.0 }
  0xe7   :  { %v242_v52 = vmax.f32 %v182_v48, 0.0 }
  0xe8   :  { %v348_v53 = vpack.c.bf16 %v244_v50, %v243_v49 }
  0xe9   :  { %v347_v54 = vpack.c.bf16 %v242_v52, %v241_v51  ;;  %v1177_v55 = vpop.f32.mrb[4].mxu0  ;;  %v1318_v52 = vld [vmem:[%s1782_s2 + $0x90] sm:$0xff]  }
  0xea   :  { %v203_v56 = vadd.f32 %v1177_v55, %v1064_v40  ;;  %v194_v57 = vpop.f32.mrb[5].mxu0  ;;  %1249 = vmatprep.subr.bf16.mxu0 %v1318_v52 }
  0xeb   :  { %v195_v58 = vadd.f32 %v1064_v40, %v194_v57  ;;  %v1178_v59 = vpop.f32.mrb[6].mxu0  ;;  %1221 = vmatprep.mubr.bf16.mxu1 %v347_v54  ;;  %1250 = vmatpush3.bf16.msra.mxu0 %v1318_v52 }
  0xec   :  { %v206_v60 = vadd.f32 %v1178_v59, %v1064_v40  ;;  %v197_v61 = vpop.f32.mrb[7].mxu0  ;;  %1222 = vmatmul.mubr.bf16.vlgmr.msra.gmra.mrb[0].mxu1 %v348_v53  ;;  %v247_v63 = vmax.f32 %v203_v56, 0.0  ;;  %v1319_v53 = vld [vmem:[%s1782_s2 + $0x98] sm:$0xff]  }
  0xed   :  { %v198_v62 = vadd.f32 %v1064_v40, %v197_v61  ;;  %v245_v1 = vmax.f32 %v195_v58, 0.0  ;;  %1251 = vmatprep.subr.bf16.mxu0 %v1319_v53 }
  0xee   :  { %v248_v0 = vmax.f32 %v206_v60, 0.0 }
  0xef   :  { %v246_v2 = vmax.f32 %v198_v62, 0.0  ;;  %1252 = vmatpush3.bf16.msra.mxu0 %v1319_v53 }
  0xf0   :  { %v350_v3 = vpack.c.bf16 %v248_v0, %v247_v63 }
  0xf1   :  { %v349_v4 = vpack.c.bf16 %v246_v2, %v245_v1  ;;  %v1181_v5 = vpop.f32.mrb[8].mxu0 }
  0xf2   :  { %v219_v6 = vadd.f32 %v1181_v5, %v1064_v40  ;;  %v210_v12 = vpop.f32.mrb[9].mxu0 }
  0xf3   :  { %v211_v14 = vadd.f32 %v1064_v40, %v210_v12  ;;  %v1182_v15 = vpop.f32.mrb[10].mxu0  ;;  %1225 = vmatprep.mubr.bf16.mxu1 %v349_v4 }
  0xf4   :  { %v222_v20 = vadd.f32 %v1182_v15, %v1064_v40  ;;  %v213_v21 = vpop.f32.mrb[11].mxu0  ;;  %1226 = vmatmul.mubr.bf16.gmra.mrb[4].mxu1 %v350_v3  ;;  %v251_v29 = vmax.f32 %v219_v6, 0.0 }
  0xf5   :  { %v214_v26 = vadd.f32 %v1064_v40, %v213_v21  ;;  %v249_v31 = vmax.f32 %v211_v14, 0.0 }
  0xf6   :  { %v252_v30 = vmax.f32 %v222_v20, 0.0 }
  0xf7   :  { %v250_v32 = vmax.f32 %v214_v26, 0.0 }
  0xf8   :  { %v352_v34 = vpack.c.bf16 %v252_v30, %v251_v29 }
  0xf9   :  { %v351_v35 = vpack.c.bf16 %v250_v32, %v249_v31  ;;  %v1185_v36 = vpop.f32.mrb[12].mxu0 }
  0xfa   :  { %v235_v37 = vadd.f32 %v1185_v36, %v1064_v40  ;;  %v226_v39 = vpop.f32.mrb[13].mxu0 }
  0xfb   :  { %v227_v41 = vadd.f32 %v1064_v40, %v226_v39  ;;  %v1186_v42 = vpop.f32.mrb[14].mxu0  ;;  %1229 = vmatprep.mubr.bf16.mxu1 %v351_v35 }
  0xfc   :  { %v238_v43 = vadd.f32 %v1186_v42, %v1064_v40  ;;  %v229_v44 = vpop.f32.mrb[15].mxu0  ;;  %1230 = vmatmul.mubr.bf16.gmra.mrb[8].mxu1 %v352_v34  ;;  %v255_v46 = vmax.f32 %v235_v37, 0.0 }
  0xfd   :  { %v230_v45 = vadd.f32 %v1064_v40, %v229_v44  ;;  %v253_v48 = vmax.f32 %v227_v41, 0.0  ;;  %v1322_v40 = vmov 1  }
  0xfe   :  { %v256_v47 = vmax.f32 %v238_v43, 0.0  ;;  %1291 = vset.pattern.permute.xlu1 %v1322_v40  ;;  %1290 = vset.pattern.permute.xlu0 %v1322_v40 }
  0xff   :  { %v254_v49 = vmax.f32 %v230_v45, 0.0  ;;  %877 = vperm.xlu1 %1291, %v1382_v9   ;;  %874 = vperm.xlu0 %1290, %v1370_v7   ;;  %v1101_v7 = vld [vmem:[%s1785_s3 + $0x1] ss:$0 sm:$0xff] }
 0x100   :  { %v354_v50 = vpack.c.bf16 %v256_v47, %v255_v46 }
 0x101   :  { %v353_v51 = vpack.c.bf16 %v254_v49, %v253_v48 }
 0x103   :  { %1233 = vmatprep.mubr.bf16.mxu1 %v353_v51  ;;  %880 = vperm.xlu1 %1291, %v1375_v8  }
 0x104   :  { %1234 = vmatmul.mubr.bf16.gmra.mrb[12].mxu1 %v354_v50  ;;  %883 = vperm.xlu0 %1290, %v1387_v10  }
 0x107   :  { %886 = vperm.xlu1 %1291, %v1404_v13  }
 0x108   :  { %889 = vperm.xlu0 %1290, %v1394_v11  }
 0x10b   :  { %892 = vperm.xlu1 %1291, %v1422_v17  }
 0x10c   :  { %895 = vperm.xlu0 %1290, %v1415_v16  }
 0x10f   :  { %898 = vperm.xlu1 %1291, %v1434_v19  }
 0x110   :  { %901 = vperm.xlu0 %1290, %v1429_v18  }
 0x113   :  { %904 = vperm.xlu1 %1291, %v1454_v23  }
 0x114   :  { %907 = vperm.xlu0 %1290, %v1449_v22  }
 0x117   :  { %910 = vperm.xlu1 %1291, %v1468_v25  }
 0x118   :  { %913 = vperm.xlu0 %1290, %v1463_v24  }
 0x11b   :  { %916 = vperm.xlu1 %1291, %v1483_v28  }
 0x11c   :  { %919 = vperm.xlu0 %1290, %v1478_v27  }
 0x17e   :  { %v878_v50 = vpop.permute.xlu1 %877  ;;  %v875_v51 = vpop.permute.xlu0 %874 }
 0x17f   :  { %vm921_vm3 = vcmp.eq.s32.totalorder %v1497_v33, %v875_v51  ;;  %vm922_vm4 = vcmp.eq.s32.totalorder %v1497_v33, %v878_v50 }
 0x182   :  { %v881_v52 = vpop.permute.xlu1 %880 }
 0x183   :  { %v884_v53 = vpop.permute.xlu0 %883  ;;  %vm923_vm2 = vcmp.eq.s32.totalorder %v1497_v33, %v881_v52 }
 0x184   :  { %vm924_vm5 = vcmp.eq.s32.totalorder %v1497_v33, %v884_v53 }
 0x186   :  { %v1600_v40 = vpop.permute.xlu1 %886 }
 0x187   :  { %vm925_vm8 = vcmp.eq.s32.totalorder %v1497_v33, %v1600_v40 }
 0x1bf   :  { %v1223_v8 = vpop.f32.mrb[0].mxu1 }
 0x1c0   :  { %v653_v9 = vadd.f32 %v1223_v8, %v1101_v7  ;;  %v583_v10 = vpop.f32.mrb[1].mxu1  ;;  %v1603_v8 = vpop.permute.xlu0 %889 }
 0x1c1   :  { %v651_v11 = vadd.f32 %v1101_v7, %v583_v10  ;;  %v1224_v13 = vpop.f32.mrb[2].mxu1  ;;  %v939_v10 = vsel %vm923_vm2, 1.0, %v1321_v38  ;;  %vm926_vm9 = vcmp.eq.s32.totalorder %v1497_v33, %v1603_v8  ;;  %vm1043_vm2 = vcmask 7168  }
 0x1c2   :  { %v654_v16 = vadd.f32 %v1224_v13, %v1101_v7  ;;  %v586_v17 = vpop.f32.mrb[3].mxu1  ;;  %v669_v19 = vmax.f32 %v653_v9, 0.0  ;;  %v1614_v9 = vld [vmem:[%s1785_s3 + $0x4] ss:$0 sm:$0xff]  ;;  %v893_v13 = vpop.permute.xlu1 %892 }
 0x1c3   :  { %v652_v18 = vadd.f32 %v1101_v7, %v586_v17  ;;  %v667_v23 = vmax.f32 %v651_v11, 0.0  ;;  %vm927_vm6 = vcmp.eq.s32.totalorder %v1497_v33, %v893_v13 }
 0x1c4   :  { %v670_v22 = vmax.f32 %v654_v16, 0.0 }
 0x1c5   :  { %v668_v24 = vmax.f32 %v652_v18, 0.0  ;;  %v937_v18 = vsel %vm921_vm3, 1.0, %v1321_v38 }
 0x1c6   :  { %v684_v25 = vpack.c.bf16 %v670_v22, %v669_v19  ;;  %v1623_v19 = vld [vmem:[%s1785_s3 + $0x3] ss:$0 sm:$0xff] }
 0x1c7   :  { %v683_v28 = vpack.c.bf16 %v668_v24, %v667_v23  ;;  %v1227_v54 = vpop.f32.mrb[4].mxu1  ;;  %v981_v24 = vmul.f32 %v1614_v9, %v939_v10 }
 0x1c8   :  { %v657_v27 = vadd.f32 %v1227_v54, %v1101_v7  ;;  %v599_v55 = vpop.f32.mrb[5].mxu1 }
 0x1c9   :  { %v655_v56 = vadd.f32 %v1101_v7, %v599_v55  ;;  %v1228_v57 = vpop.f32.mrb[6].mxu1  ;;  %1253 = vmatprep.mubr.bf16.mxu0 %v683_v28  ;;  %v938_v55 = vsel %vm922_vm4, 1.0, %v1321_v38 }
 0x1ca   :  { %v658_v58 = vadd.f32 %v1228_v57, %v1101_v7  ;;  %v602_v59 = vpop.f32.mrb[7].mxu1  ;;  %1254 = vmatmul.mubr.bf16.vlgmr.msra.gmra.mrb[16].mxu0 %v684_v25  ;;  %v673_v61 = vmax.f32 %v657_v27, 0.0  ;;  %v896_v25 = vpop.permute.xlu0 %895 }
 0x1cb   :  { %v656_v60 = vadd.f32 %v1101_v7, %v602_v59  ;;  %v671_v63 = vmax.f32 %v655_v56, 0.0  ;;  %vm928_vm7 = vcmp.eq.s32.totalorder %v1497_v33, %v896_v25 }
 0x1cc   :  { %v674_v62 = vmax.f32 %v658_v58, 0.0 }
 0x1cd   :  { %v672_v0 = vmax.f32 %v656_v60, 0.0  ;;  %v979_v60 = vmul.f32 %v1614_v9, %v937_v18 }
 0x1ce   :  { %v686_v1 = vpack.c.bf16 %v674_v62, %v673_v61  ;;  %v940_v61 = vsel %vm924_vm5, 1.0, %v1321_v38 }
 0x1cf   :  { %v685_v2 = vpack.c.bf16 %v672_v0, %v671_v63  ;;  %v1231_v3 = vpop.f32.mrb[8].mxu1  ;;  %v980_v0 = vmul.f32 %v1614_v9, %v938_v55 }
 0x1d0   :  { %v661_v4 = vadd.f32 %v1231_v3, %v1101_v7  ;;  %v615_v5 = vpop.f32.mrb[9].mxu1 }
 0x1d1   :  { %v659_v6 = vadd.f32 %v1101_v7, %v615_v5  ;;  %v1232_v12 = vpop.f32.mrb[10].mxu1  ;;  %1257 = vmatprep.mubr.bf16.mxu0 %v685_v2 }
 0x1d2   :  { %v662_v14 = vadd.f32 %v1232_v12, %v1101_v7  ;;  %v618_v15 = vpop.f32.mrb[11].mxu1  ;;  %1258 = vmatmul.mubr.bf16.gmra.mrb[20].mxu0 %v686_v1  ;;  %v677_v21 = vmax.f32 %v661_v4, 0.0  ;;  %v1637_v1 = vpop.permute.xlu1 %898  ;;  %v982_v12 = vmul.f32 %v1614_v9, %v940_v61 }
 0x1d3   :  { %v660_v20 = vadd.f32 %v1101_v7, %v618_v15  ;;  %v675_v29 = vmax.f32 %v659_v6, 0.0  ;;  %vm929_vm12 = vcmp.eq.s32.totalorder %v1497_v33, %v1637_v1 }
 0x1d4   :  { %v678_v26 = vmax.f32 %v662_v14, 0.0  ;;  %v1643_v14 = vpop.permute.xlu0 %901 }
 0x1d5   :  { %v676_v30 = vmax.f32 %v660_v20, 0.0  ;;  %vm930_vm13 = vcmp.eq.s32.totalorder %v1497_v33, %v1643_v14 }
 0x1d6   :  { %v688_v31 = vpack.c.bf16 %v678_v26, %v677_v21  ;;  %v943_v21 = vsel %vm927_vm6, 1.0, %v1321_v38 }
 0x1d7   :  { %v687_v32 = vpack.c.bf16 %v676_v30, %v675_v29  ;;  %v1235_v34 = vpop.f32.mrb[12].mxu1 }
 0x1d8   :  { %v665_v35 = vadd.f32 %v1235_v34, %v1101_v7  ;;  %v631_v36 = vpop.f32.mrb[13].mxu1 }
 0x1d9   :  { %v663_v37 = vadd.f32 %v1101_v7, %v631_v36  ;;  %v1236_v39 = vpop.f32.mrb[14].mxu1  ;;  %1261 = vmatprep.mubr.bf16.mxu0 %v687_v32 }
 0x1da   :  { %v666_v41 = vadd.f32 %v1236_v39, %v1101_v7  ;;  %v634_v42 = vpop.f32.mrb[15].mxu1  ;;  %1262 = vmatmul.mubr.bf16.gmra.mrb[24].mxu0 %v688_v31  ;;  %v681_v44 = vmax.f32 %v665_v35, 0.0  ;;  %v944_v31 = vsel %vm928_vm7, 1.0, %v1321_v38 }
 0x1db   :  { %v664_v43 = vadd.f32 %v1101_v7, %v634_v42  ;;  %v679_v46 = vmax.f32 %v663_v37, 0.0  ;;  %v1608_v7 = vld [vmem:[%s1785_s3 + $0x2] ss:$0 sm:$0xff]  ;;  %v905_v42 = vpop.permute.xlu1 %904 }
 0x1dc   :  { %v682_v45 = vmax.f32 %v666_v41, 0.0  ;;  %v985_v41 = vmul.f32 %v1614_v9, %v943_v21  ;;  %vm931_vm10 = vcmp.eq.s32.totalorder %v1497_v33, %v905_v42 }
 0x1dd   :  { %v680_v47 = vmax.f32 %v664_v43, 0.0 }
 0x1de   :  { %v690_v48 = vpack.c.bf16 %v682_v45, %v681_v44  ;;  %v941_v45 = vsel %vm925_vm8, 1.0, %v1321_v38 }
 0x1df   :  { %v689_v49 = vpack.c.bf16 %v680_v47, %v679_v46  ;;  %v942_v46 = vsel %vm926_vm9, 1.0, %v1321_v38  ;;  %v986_v47 = vmul.f32 %v1614_v9, %v944_v31  ;;  %v983_v40 = vmul.f32 %v1614_v9, %v941_v45 }
 0x1e1   :  { %1265 = vmatprep.mubr.bf16.mxu0 %v689_v49  ;;  %v908_v49 = vpop.permute.xlu0 %907 }
 0x1e2   :  { %1266 = vmatmul.mubr.bf16.gmra.mrb[28].mxu0 %v690_v48  ;;  %vm932_vm11 = vcmp.eq.s32.totalorder %v1497_v33, %v908_v49 }
 0x29d   :  { %v1255_v11 = vpop.f32.mrb[16].mxu0 }
 0x29e   :  { %v803_v16 = vadd.f32 %v1255_v11, %v1608_v7  ;;  %v794_v17 = vpop.f32.mrb[17].mxu0 }
 0x29f   :  { %v795_v22 = vadd.f32 %v1608_v7, %v794_v17  ;;  %v1256_v23 = vpop.f32.mrb[18].mxu0  ;;  %v947_v17 = vsel %vm931_vm10, 1.0, %v1321_v38 }
 0x2a0   :  { %v859_v28 = vmax.f32 %v803_v16, 0.0  ;;  %v806_v54 = vadd.f32 %v1256_v23, %v1608_v7  ;;  %v797_v27 = vpop.f32.mrb[19].mxu0  ;;  %v984_v16 = vmul.f32 %v1614_v9, %v942_v46  ;;  %v948_v23 = vsel %vm932_vm11, 1.0, %v1321_v38 }
 0x2a1   :  { %v857_v56 = vmax.f32 %v795_v22, 0.0  ;;  %v798_v57 = vadd.f32 %v1608_v7, %v797_v27 }
 0x2a2   :  { %v960_v58 = vmul.f32 %v1623_v19, %v859_v28  ;;  %v860_v59 = vmax.f32 %v806_v54, 0.0 }
 0x2a3   :  { %v958_v62 = vmul.f32 %v1623_v19, %v857_v56  ;;  %v858_v63 = vmax.f32 %v798_v57, 0.0  ;;  %v989_v57 = vmul.f32 %v1614_v9, %v947_v17 }
 0x2a4   :  { %v997_v2 = vadd.f32 %v981_v24, %v960_v58  ;;  %v961_v3 = vmul.f32 %v1623_v19, %v860_v59  ;;  %v911_v24 = vpop.permute.xlu1 %910  ;;  %v914_v58 = vpop.permute.xlu0 %913 }
 0x2a5   :  { %v959_v4 = vmul.f32 %v1623_v19, %v858_v63  ;;  %v1259_v5 = vpop.f32.mrb[20].mxu0  ;;  %v995_v6 = vadd.f32 %v979_v60, %v958_v62  ;;  %v945_v62 = vsel %vm929_vm12, 1.0, %v1321_v38  ;;  %v990_v63 = vmul.f32 %v1614_v9, %v948_v23 }
 0x2a6   :  { %v819_v15 = vadd.f32 %v1259_v5, %v1608_v7  ;;  %1015 = vadd.xlane.f32.xlu0 %v997_v2  ;;  %v810_v20 = vpop.f32.mrb[21].mxu0  ;;  %v998_v39 = vadd.f32 %v982_v12, %v961_v3  ;;  %vm933_vm14 = vcmp.eq.s32.totalorder %v1497_v33, %v911_v24  ;;  %v946_v5 = vsel %vm930_vm13, 1.0, %v1321_v38 }
 0x2a7   :  { %v811_v26 = vadd.f32 %v1608_v7, %v810_v20  ;;  %v1260_v29 = vpop.f32.mrb[22].mxu0  ;;  %1011 = vadd.xlane.f32.xlu1 %v995_v6  ;;  %v996_v30 = vadd.f32 %v980_v0, %v959_v4  ;;  %v987_v1 = vmul.f32 %v1614_v9, %v945_v62  ;;  %vm934_vm15 = vcmp.eq.s32.totalorder %v1497_v33, %v914_v58 }
 0x2a8   :  { %v863_v32 = vmax.f32 %v819_v15, 0.0  ;;  %v822_v34 = vadd.f32 %v1260_v29, %v1608_v7  ;;  %v813_v35 = vpop.f32.mrb[23].mxu0  ;;  %v917_v12 = vpop.permute.xlu1 %916  ;;  %v949_v29 = vsel %vm933_vm14, 1.0, %v1321_v38  ;;  %v988_v14 = vmul.f32 %v1614_v9, %v946_v5 }
 0x2a9   :  { %v861_v36 = vmax.f32 %v811_v26, 0.0  ;;  %v814_v37 = vadd.f32 %v1608_v7, %v813_v35  ;;  %vm935_vm0 = vcmp.eq.s32.totalorder %v1497_v33, %v917_v12  ;;  %v991_v42 = vmul.f32 %v1614_v9, %v949_v29 }
 0x2aa   :  { %v964_v43 = vmul.f32 %v1623_v19, %v863_v32  ;;  %v864_v44 = vmax.f32 %v822_v34, 0.0  ;;  %1013 = vadd.xlane.f32.xlu0 %v996_v30  ;;  %v920_v32 = vpop.permute.xlu0 %919 }
 0x2ab   :  { %v862_v48 = vmax.f32 %v814_v37, 0.0  ;;  %1017 = vadd.xlane.f32.xlu1 %v998_v39  ;;  %v962_v50 = vmul.f32 %v1623_v19, %v861_v36  ;;  %vm936_vm1 = vcmp.eq.s32.totalorder %v1497_v33, %v920_v32 }
 0x2ac   :  { %v965_v51 = vmul.f32 %v1623_v19, %v864_v44  ;;  %v1001_v52 = vadd.f32 %v985_v41, %v964_v43  ;;  %v950_v43 = vsel %vm934_vm15, 1.0, %v1321_v38 }
 0x2ad   :  { %v1263_v53 = vpop.f32.mrb[24].mxu0  ;;  %v963_v8 = vmul.f32 %v1623_v19, %v862_v48  ;;  %v999_v27 = vadd.f32 %v983_v40, %v962_v50  ;;  %v951_v48 = vsel %vm935_vm0, 1.0, %v1321_v38  ;;  %v992_v49 = vmul.f32 %v1614_v9, %v950_v43 }
 0x2ae   :  { %v835_v10 = vadd.f32 %v1263_v53, %v1608_v7  ;;  %1023 = vadd.xlane.f32.xlu0 %v1001_v52  ;;  %v826_v11 = vpop.f32.mrb[25].mxu0  ;;  %v1002_v13 = vadd.f32 %v986_v47, %v965_v51  ;;  %v952_v52 = vsel %vm936_vm1, 1.0, %v1321_v38  ;;  %v993_v53 = vmul.f32 %v1614_v9, %v951_v48 }
 0x2af   :  { %v827_v18 = vadd.f32 %v1608_v7, %v826_v11  ;;  %v1264_v22 = vpop.f32.mrb[26].mxu0  ;;  %v1000_v61 = vadd.f32 %v984_v16, %v963_v8  ;;  %v994_v8 = vmul.f32 %v1614_v9, %v952_v52 }
 0x2b0   :  { %v867_v25 = vmax.f32 %v835_v10, 0.0  ;;  %v838_v28 = vadd.f32 %v1264_v22, %v1608_v7  ;;  %v829_v54 = vpop.f32.mrb[27].mxu0  ;;  %1025 = vadd.xlane.f32.xlu1 %v1002_v13 }
 0x2b1   :  { %v865_v55 = vmax.f32 %v827_v18, 0.0  ;;  %v830_v56 = vadd.f32 %v1608_v7, %v829_v54 }
 0x2b2   :  { %v968_v59 = vmul.f32 %v1623_v19, %v867_v25  ;;  %v868_v60 = vmax.f32 %v838_v28, 0.0  ;;  %1019 = vadd.xlane.f32.xlu0 %v999_v27 }
 0x2b3   :  { %v866_v0 = vmax.f32 %v830_v56, 0.0  ;;  %v966_v2 = vmul.f32 %v1623_v19, %v865_v55 }
 0x2b4   :  { %v969_v3 = vmul.f32 %v1623_v19, %v868_v60  ;;  %1021 = vadd.xlane.f32.xlu1 %v1000_v61  ;;  %v1005_v4 = vadd.f32 %v989_v57, %v968_v59 }
 0x2b5   :  { %v1267_v6 = vpop.f32.mrb[28].mxu0  ;;  %v967_v15 = vmul.f32 %v1623_v19, %v866_v0  ;;  %v1003_v36 = vadd.f32 %v987_v1, %v966_v2 }
 0x2b6   :  { %v851_v20 = vadd.f32 %v1267_v6, %v1608_v7  ;;  %1031 = vadd.xlane.f32.xlu0 %v1005_v4  ;;  %v842_v21 = vpop.f32.mrb[29].mxu0  ;;  %v1006_v26 = vadd.f32 %v990_v63, %v969_v3 }
 0x2b7   :  { %v843_v30 = vadd.f32 %v1608_v7, %v842_v21  ;;  %v1268_v31 = vpop.f32.mrb[30].mxu0  ;;  %v1004_v44 = vadd.f32 %v988_v14, %v967_v15 }
 0x2b8   :  { %v854_v34 = vadd.f32 %v1268_v31, %v1608_v7  ;;  %v845_v35 = vpop.f32.mrb[31].mxu0  ;;  %1033 = vadd.xlane.f32.xlu1 %v1006_v26  ;;  %v871_v37 = vmax.f32 %v851_v20, 0.0 }
 0x2b9   :  { %v869_v39 = vmax.f32 %v843_v30, 0.0  ;;  %v846_v41 = vadd.f32 %v1608_v7, %v845_v35 }
 0x2ba   :  { %1027 = vadd.xlane.f32.xlu0 %v1003_v36  ;;  %v872_v46 = vmax.f32 %v854_v34, 0.0  ;;  %v972_v50 = vmul.f32 %v1623_v19, %v871_v37 }
 0x2bb   :  { %v970_v45 = vmul.f32 %v1623_v19, %v869_v39  ;;  %v870_v47 = vmax.f32 %v846_v41, 0.0 }
 0x2bc   :  { %1029 = vadd.xlane.f32.xlu1 %v1004_v44  ;;  %v973_v33 = vmul.f32 %v1623_v19, %v872_v46  ;;  %v1009_v10 = vadd.f32 %v993_v53, %v972_v50 }
 0x2bd   :  { %v971_v7 = vmul.f32 %v1623_v19, %v870_v47  ;;  %v1007_v51 = vadd.f32 %v991_v42, %v970_v45 }
 0x2be   :  { %v1010_v11 = vadd.f32 %v994_v8, %v973_v33 }
 0x2bf   :  { %1035 = vadd.xlane.f32.xlu0 %v1007_v51  ;;  %v1008_v40 = vadd.f32 %v992_v49, %v971_v7 }
 0x2c1   :  { %1037 = vadd.xlane.f32.xlu1 %v1008_v40 }
 0x2c3   :  { %1039 = vadd.xlane.f32.xlu0 %v1009_v10 }
 0x2c5   :  { %1041 = vadd.xlane.f32.xlu1 %v1010_v11 }
 0x333   :  { %v1016_v13 = vpop.xlane.xlu0 %1015 }
 0x334   :  { %1046 = vst.msk [vmem:[%s1786_s4 + $0x10] sm:$0xff] %vm1043_vm2, %v1016_v13  ;;  %v1012_v38 = vpop.xlane.xlu1 %1011 }
 0x335   :  { %1044 = vst.msk [vmem:[%s1786_s4] sm:$0xff] %vm1043_vm2, %v1012_v38 }
 0x337   :  { %v1014_v19 = vpop.xlane.xlu0 %1013 }
 0x338   :  { %1045 = vst.msk [vmem:[%s1786_s4 + $0x8] sm:$0xff] %vm1043_vm2, %v1014_v19  ;;  %v1018_v9 = vpop.xlane.xlu1 %1017 }
 0x339   :  { %1047 = vst.msk [vmem:[%s1786_s4 + $0x18] sm:$0xff] %vm1043_vm2, %v1018_v9 }
 0x33b   :  { %v1024_v16 = vpop.xlane.xlu0 %1023 }
 0x33c   :  { %1050 = vst.msk [vmem:[%s1786_s4 + $0x30] sm:$0xff] %vm1043_vm2, %v1024_v16 }
 0x33d   :  { %v1026_v17 = vpop.xlane.xlu1 %1025 }
 0x33e   :  { %1051 = vst.msk [vmem:[%s1786_s4 + $0x38] sm:$0xff] %vm1043_vm2, %v1026_v17 }
 0x33f   :  { %v1020_v18 = vpop.xlane.xlu0 %1019 }
 0x340   :  { %1048 = vst.msk [vmem:[%s1786_s4 + $0x20] sm:$0xff] %vm1043_vm2, %v1020_v18 }
 0x341   :  { %v1022_v22 = vpop.xlane.xlu1 %1021 }
 0x342   :  { %1049 = vst.msk [vmem:[%s1786_s4 + $0x28] sm:$0xff] %vm1043_vm2, %v1022_v22 }
 0x343   :  { %v1032_v23 = vpop.xlane.xlu0 %1031 }
 0x344   :  { %1054 = vst.msk [vmem:[%s1786_s4 + $0x50] sm:$0xff] %vm1043_vm2, %v1032_v23 }
 0x345   :  { %v1034_v24 = vpop.xlane.xlu1 %1033 }
 0x346   :  { %1055 = vst.msk [vmem:[%s1786_s4 + $0x58] sm:$0xff] %vm1043_vm2, %v1034_v24 }
 0x347   :  { %v1028_v25 = vpop.xlane.xlu0 %1027 }
 0x348   :  { %1052 = vst.msk [vmem:[%s1786_s4 + $0x40] sm:$0xff] %vm1043_vm2, %v1028_v25 }
 0x349   :  { %v1030_v28 = vpop.xlane.xlu1 %1029 }
 0x34a   :  { %1053 = vst.msk [vmem:[%s1786_s4 + $0x48] sm:$0xff] %vm1043_vm2, %v1030_v28 }
 0x34c   :  { %v1036_v54 = vpop.xlane.xlu0 %1035 }
 0x34d   :  { %1056 = vst.msk [vmem:[%s1786_s4 + $0x60] sm:$0xff] %vm1043_vm2, %v1036_v54 }
 0x34e   :  { %v1038_v27 = vpop.xlane.xlu1 %1037 }
 0x34f   :  { %1057 = vst.msk [vmem:[%s1786_s4 + $0x68] sm:$0xff] %vm1043_vm2, %v1038_v27 }
 0x350   :  { %v1040_v55 = vpop.xlane.xlu0 %1039 }
 0x351   :  { %1058 = vst.msk [vmem:[%s1786_s4 + $0x70] sm:$0xff] %vm1043_vm2, %v1040_v55 }
 0x352   :  { %v1042_v56 = vpop.xlane.xlu1 %1041 }
 0x353   :  { %1059 = vst.msk [vmem:[%s1786_s4 + $0x78] sm:$0xff] %vm1043_vm2, %v1042_v56 }

</bundles_post_ra>
